<compile_context>
chip_gen: v5e
topology: v5e:2x2
jax: 0.10.0
libtpu: 0.0.40
codegen_flags: <defaults>
</compile_context>

<pallas_src>
import jax
import jax.numpy as jnp
from jax import lax
from jax.experimental import pallas as pl
from jax.experimental.pallas import tpu as pltpu

EPS = 1e-5                    # PyTorch BatchNorm1d default eps
MATMUL_DTYPE = jnp.bfloat16   # bf16 in, f32 accumulate on the MXU
LANE = 128
SUBLANE = 8


def _round_up(n, m):
    return (n + m - 1) // m * m


def make_fcnet_kernel(sizes, residual, n_bn):
    """Build the Pallas kernel body, closed over static config."""
    n_lin = len(sizes) - 1

    def kernel(x_ref, w_ref, p_ref, out_ref):
        # x_ref : (B, F) f32   activations, feature-padded to F (multiple of 128)
        # w_ref : (F, F) bf16  final-layer weight, zero-padded
        # p_ref : (P, F) f32   rows [0..n_bn) = gamma_i, [n_bn..2*n_bn) = beta_i,
        #                      row 2*n_bn = final-layer bias
        # out_ref: (B, F) f32
        x = x_ref[...]
        params = p_ref[...]          # single small load; sliced statically below

        if residual == 2:
            # Mirrors `torch.zeros(hidden_size)`.  Dead w.r.t. the output in the
            # PyTorch source (x is overwritten by `x = tmp` right after), so JAX
            # DCE removes it; kept for control-flow fidelity.
            res_tmp = jnp.zeros((1, x.shape[1]), jnp.float32)
            num_res = 0

        for i in range(n_lin):
            in_f, out_f = sizes[i], sizes[i + 1]

            if i < n_lin - 1:
                # PyTorch: tmp = layer(x); tmp = normal[i](x); tmp = relu(tmp)
                # The Linear output is discarded, so it is never computed here.
                # BatchNorm1d(track_running_stats=False): batch stats, biased
                # variance, computed as E[x^2] - E[x]^2 in f32 (VPU/XLU).
                mean = jnp.mean(x, axis=0, keepdims=True)
                mean_sq = jnp.mean(x * x, axis=0, keepdims=True)
                var = jnp.maximum(mean_sq - mean * mean, 0.0)
                gamma = params[i:i + 1, :]
                beta = params[n_bn + i:n_bn + i + 1, :]
                tmp = gamma * ((x - mean) * lax.rsqrt(var + EPS)) + beta
                tmp = jnp.maximum(tmp, 0.0)                       # ReLU
            else:
                # Final layer: the only live Linear.  bf16 operands, f32 acc (MXU).
                bias = params[2 * n_bn:2 * n_bn + 1, :]
                tmp = jnp.dot(
                    x.astype(MATMUL_DTYPE), w_ref[...],
                    preferred_element_type=jnp.float32,
                ) + bias

            # Residual plumbing: identical control flow to the PyTorch source.
            if in_f == out_f:
                if residual == 2:
                    num_res = num_res + 1
                    res_tmp = res_tmp + tmp
                    x = x + res_tmp / num_res
                if residual == 1:
                    x = x + tmp
                else:
                    x = tmp
            else:
                x = tmp

        out_ref[...] = x.astype(out_ref.dtype)

    return kernel


def fcnet_forward(x, weights, biases, gammas, betas, sizes, residual):
    """Pad to lane-dense shapes, pack params into slabs, run the gridless kernel."""
    n_lin = len(sizes) - 1
    n_bn = n_lin - 1
    batch = x.shape[0]
    feat = _round_up(max(sizes), LANE)        # common padded feature width

    # Activations: zero-pad the feature axis only (batch axis is left logical so
    # BatchNorm statistics are untouched).
    x_pad = jnp.zeros((batch, feat), jnp.float32)
    x_pad = x_pad.at[:, :sizes[0]].set(x.astype(jnp.float32))

    # Only the final layer's Linear survives; pad it and store as bf16.
    w_pad = jnp.zeros((feat, feat), jnp.float32)
    w_pad = w_pad.at[:sizes[-2], :sizes[-1]].set(
        jnp.asarray(weights[-1], jnp.float32).reshape(sizes[-2], sizes[-1]))
    w_pad = w_pad.astype(MATMUL_DTYPE)

    # Pack BN gammas, BN betas and the final bias into one (P, feat) slab.
    n_rows = 2 * n_bn + 1
    p_rows = _round_up(n_rows, SUBLANE)
    slab = jnp.zeros((p_rows, feat), jnp.float32)
    for i in range(n_bn):
        slab = slab.at[i, :sizes[i + 1]].set(
            jnp.asarray(gammas[i], jnp.float32).reshape(-1))
        slab = slab.at[n_bn + i, :sizes[i + 1]].set(
            jnp.asarray(betas[i], jnp.float32).reshape(-1))
    slab = slab.at[2 * n_bn, :sizes[-1]].set(
        jnp.asarray(biases[-1], jnp.float32).reshape(-1))

    kernel = make_fcnet_kernel(sizes, residual, n_bn)
    vmem = pl.BlockSpec(memory_space=pltpu.MemorySpace.VMEM)
    out_pad = pl.pallas_call(
        kernel,
        out_shape=jax.ShapeDtypeStruct((batch, feat), jnp.float32),
        in_specs=[vmem, vmem, vmem],
        out_specs=vmem,
    )(x_pad, w_pad, slab)
    return out_pad[:, :sizes[-1]]


def fcnet_ref(x, weights, biases, gammas, betas, sizes, residual):
    """Pure-JAX f32 reference mirroring the PyTorch forward line by line."""
    n_lin = len(sizes) - 1
    x = x.astype(jnp.float32)
    if residual == 2:
        res_tmp = jnp.zeros((sizes[1],), jnp.float32)
        num_res = 0
    for i in range(n_lin):
        in_f, out_f = sizes[i], sizes[i + 1]
        w = jnp.asarray(weights[i], jnp.float32).reshape(in_f, out_f)
        b = jnp.asarray(biases[i], jnp.float32).reshape(-1)
        tmp = x @ w + b                   # dead for i < n_lin-1, as in PyTorch
        if i < n_lin - 1:
            g = jnp.asarray(gammas[i], jnp.float32).reshape(-1)
            be = jnp.asarray(betas[i], jnp.float32).reshape(-1)
            mean = jnp.mean(x, axis=0, keepdims=True)
            var = jnp.mean((x - mean) ** 2, axis=0, keepdims=True)
            tmp = g * ((x - mean) / jnp.sqrt(var + EPS)) + be
            tmp = jnp.maximum(tmp, 0.0)
        if in_f == out_f:
            if residual == 2:
                num_res = num_res + 1
                res_tmp = res_tmp + tmp
                x = x + res_tmp / num_res
            if residual == 1:
                x = x + tmp
            else:
                x = tmp
        else:
            x = tmp
    return x


if __name__ == "__main__":
    # input_size == hidden_size is required for the module's forward to be
    # well-defined (BatchNorm_i has num_features == out_features of layer i but
    # is applied to the layer *input*).
    BATCH = 8
    INPUT_SIZE = 32
    HIDDEN_SIZE = 32
    OUTPUT_SIZE = 16
    NUM_LAYERS = 3
    RESIDUAL = 1

    sizes = [INPUT_SIZE] + [HIDDEN_SIZE] * NUM_LAYERS + [OUTPUT_SIZE]

    key = jax.random.PRNGKey(0)
    key, kx = jax.random.split(key)
    x = jax.random.normal(kx, (BATCH, INPUT_SIZE), jnp.float32)

    weights, biases, gammas, betas = [], [], [], []
    for fi, fo in zip(sizes, sizes[1:]):
        key, kw, kb, kg, kbe = jax.random.split(key, 5)
        bound = 1.0 / (fi ** 0.5)   # PyTorch Linear default init range
        weights.append(jax.random.uniform(kw, (fi, fo), jnp.float32, -bound, bound))
        biases.append(jax.random.uniform(kb, (fo,), jnp.float32, -bound, bound))
        gammas.append(1.0 + 0.1 * jax.random.normal(kg, (fo,), jnp.float32))
        betas.append(0.1 * jax.random.normal(kbe, (fo,), jnp.float32))

    out = fcnet_forward(x, weights, biases, gammas, betas, sizes, RESIDUAL)
    out = jax.block_until_ready(out)
    assert out.shape == (BATCH, OUTPUT_SIZE)

    ref = fcnet_ref(x, weights, biases, gammas, betas, sizes, RESIDUAL)
    # Tolerance accounts for the bf16-operand / f32-accumulate final matmul;
    # BN/ReLU/residual math is exact f32.  Real bugs produce O(1) errors.
    assert jnp.allclose(out, ref, atol=5e-2, rtol=5e-2), "mismatch vs JAX reference"

    print("KERNEL_OK")
</pallas_src>

<mosaic_0001>
module attributes {stable_mosaic.version = 11 : i64} {
  func.func @kernel(%arg0: memref<8x128xf32, #tpu.memory_space<vmem>>, %arg1: memref<128x128xbf16, #tpu.memory_space<vmem>>, %arg2: memref<8x128xf32, #tpu.memory_space<vmem>>, %arg3: memref<8x128xf32, #tpu.memory_space<vmem>>) attributes {dimension_semantics = [], scalar_prefetch = 0 : i64, scratch_operands = 0 : i64, tpu.core_type = #tpu.core_type<tc>} {
    %c0 = arith.constant 0 : index
    %c0_0 = arith.constant 0 : index
    %0 = vector.load %arg0[%c0, %c0_0] : memref<8x128xf32, #tpu.memory_space<vmem>>, vector<8x128xf32>
    %c0_1 = arith.constant 0 : index
    %c0_2 = arith.constant 0 : index
    %1 = vector.load %arg2[%c0_1, %c0_2] : memref<8x128xf32, #tpu.memory_space<vmem>>, vector<8x128xf32>
    %cst = arith.constant dense<0.000000e+00> : vector<128xf32>
    %2 = vector.multi_reduction <add>, %0, %cst [0] : vector<8x128xf32> to vector<128xf32>
    %3 = vector.shape_cast %2 : vector<128xf32> to vector<1x128xf32>
    %cst_3 = arith.constant 8.000000e+00 : f32
    %4 = vector.broadcast %cst_3 : f32 to vector<1x128xf32>
    %5 = arith.divf %3, %4 : vector<1x128xf32>
    %6 = arith.mulf %0, %0 : vector<8x128xf32>
    %cst_4 = arith.constant dense<0.000000e+00> : vector<128xf32>
    %7 = vector.multi_reduction <add>, %6, %cst_4 [0] : vector<8x128xf32> to vector<128xf32>
    %8 = vector.shape_cast %7 : vector<128xf32> to vector<1x128xf32>
    %cst_5 = arith.constant 8.000000e+00 : f32
    %9 = vector.broadcast %cst_5 : f32 to vector<1x128xf32>
    %10 = arith.divf %8, %9 : vector<1x128xf32>
    %11 = arith.mulf %5, %5 : vector<1x128xf32>
    %12 = arith.subf %10, %11 : vector<1x128xf32>
    %cst_6 = arith.constant 0.000000e+00 : f32
    %13 = vector.broadcast %cst_6 : f32 to vector<1x128xf32>
    %14 = arith.maximumf %12, %13 : vector<1x128xf32>
    %15 = vector.extract_strided_slice %1 {offsets = [0, 0], sizes = [1, 128], strides = [1, 1]} : vector<8x128xf32> to vector<1x128xf32>
    %16 = vector.extract_strided_slice %1 {offsets = [3, 0], sizes = [1, 128], strides = [1, 1]} : vector<8x128xf32> to vector<1x128xf32>
    %17 = vector.broadcast %5 : vector<1x128xf32> to vector<8x128xf32>
    %18 = arith.subf %0, %17 : vector<8x128xf32>
    %cst_7 = arith.constant 9.99999974E-6 : f32
    %19 = vector.broadcast %cst_7 : f32 to vector<1x128xf32>
    %20 = arith.addf %14, %19 : vector<1x128xf32>
    %21 = math.rsqrt %20 : vector<1x128xf32>
    %22 = vector.broadcast %21 : vector<1x128xf32> to vector<8x128xf32>
    %23 = arith.mulf %18, %22 : vector<8x128xf32>
    %24 = vector.broadcast %15 : vector<1x128xf32> to vector<8x128xf32>
    %25 = arith.mulf %24, %23 : vector<8x128xf32>
    %26 = vector.broadcast %16 : vector<1x128xf32> to vector<8x128xf32>
    %27 = arith.addf %25, %26 : vector<8x128xf32>
    %cst_8 = arith.constant 0.000000e+00 : f32
    %28 = vector.broadcast %cst_8 : f32 to vector<8x128xf32>
    %29 = arith.maximumf %27, %28 : vector<8x128xf32>
    %30 = arith.addf %0, %29 : vector<8x128xf32>
    %cst_9 = arith.constant dense<0.000000e+00> : vector<128xf32>
    %31 = vector.multi_reduction <add>, %30, %cst_9 [0] : vector<8x128xf32> to vector<128xf32>
    %32 = vector.shape_cast %31 : vector<128xf32> to vector<1x128xf32>
    %cst_10 = arith.constant 8.000000e+00 : f32
    %33 = vector.broadcast %cst_10 : f32 to vector<1x128xf32>
    %34 = arith.divf %32, %33 : vector<1x128xf32>
    %35 = arith.mulf %30, %30 : vector<8x128xf32>
    %cst_11 = arith.constant dense<0.000000e+00> : vector<128xf32>
    %36 = vector.multi_reduction <add>, %35, %cst_11 [0] : vector<8x128xf32> to vector<128xf32>
    %37 = vector.shape_cast %36 : vector<128xf32> to vector<1x128xf32>
    %cst_12 = arith.constant 8.000000e+00 : f32
    %38 = vector.broadcast %cst_12 : f32 to vector<1x128xf32>
    %39 = arith.divf %37, %38 : vector<1x128xf32>
    %40 = arith.mulf %34, %34 : vector<1x128xf32>
    %41 = arith.subf %39, %40 : vector<1x128xf32>
    %cst_13 = arith.constant 0.000000e+00 : f32
    %42 = vector.broadcast %cst_13 : f32 to vector<1x128xf32>
    %43 = arith.maximumf %41, %42 : vector<1x128xf32>
    %44 = vector.extract_strided_slice %1 {offsets = [1, 0], sizes = [1, 128], strides = [1, 1]} : vector<8x128xf32> to vector<1x128xf32>
    %45 = vector.extract_strided_slice %1 {offsets = [4, 0], sizes = [1, 128], strides = [1, 1]} : vector<8x128xf32> to vector<1x128xf32>
    %46 = vector.broadcast %34 : vector<1x128xf32> to vector<8x128xf32>
    %47 = arith.subf %30, %46 : vector<8x128xf32>
    %cst_14 = arith.constant 9.99999974E-6 : f32
    %48 = vector.broadcast %cst_14 : f32 to vector<1x128xf32>
    %49 = arith.addf %43, %48 : vector<1x128xf32>
    %50 = math.rsqrt %49 : vector<1x128xf32>
    %51 = vector.broadcast %50 : vector<1x128xf32> to vector<8x128xf32>
    %52 = arith.mulf %47, %51 : vector<8x128xf32>
    %53 = vector.broadcast %44 : vector<1x128xf32> to vector<8x128xf32>
    %54 = arith.mulf %53, %52 : vector<8x128xf32>
    %55 = vector.broadcast %45 : vector<1x128xf32> to vector<8x128xf32>
    %56 = arith.addf %54, %55 : vector<8x128xf32>
    %cst_15 = arith.constant 0.000000e+00 : f32
    %57 = vector.broadcast %cst_15 : f32 to vector<8x128xf32>
    %58 = arith.maximumf %56, %57 : vector<8x128xf32>
    %59 = arith.addf %30, %58 : vector<8x128xf32>
    %cst_16 = arith.constant dense<0.000000e+00> : vector<128xf32>
    %60 = vector.multi_reduction <add>, %59, %cst_16 [0] : vector<8x128xf32> to vector<128xf32>
    %61 = vector.shape_cast %60 : vector<128xf32> to vector<1x128xf32>
    %cst_17 = arith.constant 8.000000e+00 : f32
    %62 = vector.broadcast %cst_17 : f32 to vector<1x128xf32>
    %63 = arith.divf %61, %62 : vector<1x128xf32>
    %64 = arith.mulf %59, %59 : vector<8x128xf32>
    %cst_18 = arith.constant dense<0.000000e+00> : vector<128xf32>
    %65 = vector.multi_reduction <add>, %64, %cst_18 [0] : vector<8x128xf32> to vector<128xf32>
    %66 = vector.shape_cast %65 : vector<128xf32> to vector<1x128xf32>
    %cst_19 = arith.constant 8.000000e+00 : f32
    %67 = vector.broadcast %cst_19 : f32 to vector<1x128xf32>
    %68 = arith.divf %66, %67 : vector<1x128xf32>
    %69 = arith.mulf %63, %63 : vector<1x128xf32>
    %70 = arith.subf %68, %69 : vector<1x128xf32>
    %cst_20 = arith.constant 0.000000e+00 : f32
    %71 = vector.broadcast %cst_20 : f32 to vector<1x128xf32>
    %72 = arith.maximumf %70, %71 : vector<1x128xf32>
    %73 = vector.extract_strided_slice %1 {offsets = [2, 0], sizes = [1, 128], strides = [1, 1]} : vector<8x128xf32> to vector<1x128xf32>
    %74 = vector.extract_strided_slice %1 {offsets = [5, 0], sizes = [1, 128], strides = [1, 1]} : vector<8x128xf32> to vector<1x128xf32>
    %75 = vector.broadcast %63 : vector<1x128xf32> to vector<8x128xf32>
    %76 = arith.subf %59, %75 : vector<8x128xf32>
    %cst_21 = arith.constant 9.99999974E-6 : f32
    %77 = vector.broadcast %cst_21 : f32 to vector<1x128xf32>
    %78 = arith.addf %72, %77 : vector<1x128xf32>
    %79 = math.rsqrt %78 : vector<1x128xf32>
    %80 = vector.broadcast %79 : vector<1x128xf32> to vector<8x128xf32>
    %81 = arith.mulf %76, %80 : vector<8x128xf32>
    %82 = vector.broadcast %73 : vector<1x128xf32> to vector<8x128xf32>
    %83 = arith.mulf %82, %81 : vector<8x128xf32>
    %84 = vector.broadcast %74 : vector<1x128xf32> to vector<8x128xf32>
    %85 = arith.addf %83, %84 : vector<8x128xf32>
    %cst_22 = arith.constant 0.000000e+00 : f32
    %86 = vector.broadcast %cst_22 : f32 to vector<8x128xf32>
    %87 = arith.maximumf %85, %86 : vector<8x128xf32>
    %88 = arith.addf %59, %87 : vector<8x128xf32>
    %89 = vector.extract_strided_slice %1 {offsets = [6, 0], sizes = [1, 128], strides = [1, 1]} : vector<8x128xf32> to vector<1x128xf32>
    %90 = arith.truncf %88 : vector<8x128xf32> to vector<8x128xbf16>
    %c0_23 = arith.constant 0 : index
    %c0_24 = arith.constant 0 : index
    %91 = vector.load %arg1[%c0_23, %c0_24] : memref<128x128xbf16, #tpu.memory_space<vmem>>, vector<128x128xbf16>
    %cst_25 = arith.constant dense<0.000000e+00> : vector<8x128xf32>
    %92 = tpu.matmul %90, %91, %cst_25 {dimension_numbers = #tpu.dot_dimension_numbers<[1], [0], [0], [1], [0, 0, 1, 1], [], []>} : vector<8x128xbf16>, vector<128x128xbf16>, vector<8x128xf32> -> vector<8x128xf32>
    %93 = vector.broadcast %89 : vector<1x128xf32> to vector<8x128xf32>
    %94 = arith.addf %92, %93 : vector<8x128xf32>
    %c0_26 = arith.constant 0 : index
    %c0_27 = arith.constant 0 : index
    %95 = vector.load %arg3[%c0_26, %c0_27] : memref<8x128xf32, #tpu.memory_space<vmem>>, vector<8x128xf32>
    tpu.vector_store %arg3[%c0_26, %c0_27], %94 {strides = array<i32>} : memref<8x128xf32, #tpu.memory_space<vmem>>, vector<8x128xf32>,
    return
  }
}

</mosaic_0001>

<bundles_post_ra>
// kernel: tpu_custom_call.1
= control target key start
LH: loop header
LB: loop body
LE: loop exit
PB: predicated region body
PF: predicated region fallthrough
CT: control target
= control target key end

     0   :  { %8 = vsyncpa [#allocation3], 0  ;;  %s489_s0 = inlined_call_operand.hbm [shape: f32[8,128], index: 0, kind: input, shape index: {}]   ;;  %s490_s1 = inlined_call_operand.hbm [shape: bf16[128,128], index: 1, kind: input, shape index: {}]   ;;  %s491_s2 = inlined_call_operand.hbm [shape: f32[8,128], index: 2, kind: input, shape index: {}]   ;;  %s492_s3 = inlined_call_operand.hbm [shape: f32[8,128], index: 3, kind: output, shape index: {}]  }
   0x1   :  { %9 = vsyncpa [#allocation6], 0  ;;  %s26_s14 = sshll.u32 %s490_s1, 4  ;;  %s27_s14 = int_to_ptr.hbm [resolvable:$true] %s26_s14 }
   0x2   :  { %10 = vsyncpa [#allocation4], 0  ;;  %s433_s15 = smov [#allocation5]   ;;  %s16_s19 = sshll.u32 %s489_s0, 4  ;;  %s17_s19 = int_to_ptr.hbm [resolvable:$true] %s16_s19 }
   0x3   :  { %s28_s16 = sshll.u32 %s433_s15, 4  ;;  %s434_s20 = smov 64   ;;  %s29_s16 = int_to_ptr.vmem [resolvable:$true] %s28_s16 }
   0x4   :  { %s435_s21 = smov 4   ;;  %s436_s22 = smov [#allocation2]  }
   0x5   :  { %34 = dma.hbm_to_vmem [thread:$0]  %s27_s14, 1024, %s29_s16, [#allocation6], %s434_s20, %s434_s20, %s435_s21  }
   0x6   :  { %s18_s23 = sshll.u32 %s436_s22, 4  ;;  %s40_s26 = sshll.u32 %s491_s2, 4  ;;  %s19_s23 = int_to_ptr.vmem [resolvable:$true] %s18_s23  ;;  %s41_s26 = int_to_ptr.hbm [resolvable:$true] %s40_s26 }
   0x7   :  { %21 = dma.hbm_to_vmem [thread:$0]  %s17_s19, 128, %s19_s23, [#allocation3]  }
   0x8   :  { %s437_s1 = smov [#allocation7]  }
   0x9   :  { %s42_s27 = sshll.u32 %s437_s1, 4  ;;  %s43_s27 = int_to_ptr.vmem [resolvable:$true] %s42_s27 }
   0xa   :  { %45 = dma.hbm_to_vmem [thread:$0]  %s41_s26, 128, %s43_s27, [#allocation6]  }
   0xb   :  { %427 = dma.done.wait [#allocation3], 128  }
   0xc   :  { %428 = vsyncadd [#allocation3], 4294967168 }
   0xd   :  { %429 = dma.done.wait [#allocation6], 1152  }
   0xe   :  { %430 = vsyncadd [#allocation6], 4294966144  ;;  %v438_v0 = vmov 8.0   ;;  %v315_v2 = vld [vmem:[#allocation5 + $0x38] sm:$0xff]  ;;  %v314_v4 = vld [vmem:[#allocation5 + $0x30] sm:$0xff]  ;;  %s439_s0 = smov [#allocation8]  }
   0xf   :  { %323 = vrcp.f32 %v438_v0  ;;  %244 = vmatpush.bf16.msra.mxu0 %v315_v2  ;;  %v58_v5 = vld [vmem:[#allocation2] sm:$0xff]  ;;  %v313_v12 = vld [vmem:[#allocation5 + $0x28] sm:$0xff]  ;;  %v312_v18 = vld [vmem:[#allocation5 + $0x20] sm:$0xff]  ;;  %s263_s2 = sshll.u32 %s439_s0, 4  ;;  %s265_s30 = sshll.u32 %s492_s3, 4  ;;  %s264_s2 = int_to_ptr.vmem [resolvable:$true] %s263_s2  ;;  %s266_s30 = int_to_ptr.hbm [resolvable:$true] %s265_s30 }
  0x10   :  { %v60_v6 = vrot.slane %v58_v5, 4  ;;  %v74_v8 = vmul.f32 %v58_v5, %v58_v5  ;;  %v311_v24 = vld [vmem:[#allocation5 + $0x18] sm:$0xff]  ;;  %v310_v29 = vld [vmem:[#allocation5 + $0x10] sm:$0xff]  ;;  %v309_v32 = vld [vmem:[#allocation5 + $0x8] sm:$0xff] }
  0x11   :  { %v308_v34 = vld [vmem:[#allocation5] sm:$0xff] }
  0x12   :  { %v61_v9 = vadd.f32 %v60_v6, %v58_v5  ;;  %v75_v11 = vrot.slane %v74_v8, 4  ;;  %v473_v39 = vld [vmem:[#allocation7] sm:$0xff] }
  0x13   :  { %245 = vmatpush.bf16.msra.mxu0 %v314_v4  ;;  %v98_v43 = vperm.slane %v473_v39, 0  ;;  %v100_v46 = vperm.slane %v473_v39, 3 }
  0x14   :  { %v62_v13 = vrot.slane %v61_v9, 2  ;;  %v76_v14 = vadd.f32 %v75_v11, %v74_v8 }
  0x15   :  { %v324_v1 = vpop.eup %323 }
  0x16   :  { %v67_v3 = vmul.f32 8.0, %v324_v1  ;;  %v63_v16 = vadd.f32 %v62_v13, %v61_v9  ;;  %vm71_vm0 = vweird.f32 %v324_v1  ;;  %v77_v17 = vrot.slane %v76_v14, 2 }
  0x17   :  { %246 = vmatpush.bf16.msra.mxu0 %v313_v12  ;;  %v135_v13 = vperm.slane %v473_v39, 1 }
  0x18   :  { %v68_v7 = vsub.f32 1.0, %v67_v3  ;;  %v64_v19 = vrot.slane %v63_v16, 1  ;;  %v78_v20 = vadd.f32 %v77_v17, %v76_v14 }
  0x1a   :  { %v69_v10 = vmul.f32 %v324_v1, %v68_v7  ;;  %v65_v22 = vadd.f32 %v64_v19, %v63_v16  ;;  %v79_v23 = vrot.slane %v78_v20, 1  ;;  %v137_v16 = vperm.slane %v473_v39, 4 }
  0x1b   :  { %247 = vmatpush.bf16.msra.mxu0 %v312_v18 }
  0x1c   :  { %v70_v15 = vadd.f32 %v324_v1, %v69_v10  ;;  %v80_v26 = vadd.f32 %v79_v23, %v78_v20 }
  0x1e   :  { %v469_v21 = vsel %vm71_vm0, %v324_v1, %v70_v15 }
  0x1f   :  { %v73_v25 = vmul.f32 %v469_v21, %v65_v22  ;;  %v81_v27 = vmul.f32 %v80_v26, %v469_v21  ;;  %248 = vmatpush.bf16.msra.mxu0 %v311_v24 }
  0x21   :  { %v82_v28 = vmul.f32 %v73_v25, %v73_v25  ;;  %v85_v41 = vsub.f32 %v58_v5, %v73_v25 }
  0x23   :  { %v83_v30 = vsub.f32 %v81_v27, %v82_v28  ;;  %249 = vmatpush.bf16.msra.mxu0 %v310_v29 }
  0x25   :  { %v84_v31 = vmax.f32 %v83_v30, 0.0 }
  0x27   :  { %v86_v33 = vadd.f32 1e-05, %v84_v31  ;;  %250 = vmatpush.bf16.msra.mxu0 %v309_v32 }
  0x29   :  { %325 = vrsqrt.f32 %v86_v33  ;;  %vm93_vm1 = vweird.f32 %v86_v33 }
  0x2b   :  { %251 = vmatpush.bf16.msra.mxu0 %v308_v34 }
  0x2f   :  { %v326_v35 = vpop.eup %325 }
  0x30   :  { %v88_v36 = vmul.f32 %v326_v35, %v86_v33  ;;  %vm94_vm2 = vweird.f32 %v326_v35 }
  0x31   :  { %vm95_vm3 = vmor %vm93_vm1, %vm94_vm2 }
  0x32   :  { %v89_v37 = vmul.f32 %v326_v35, %v88_v36 }
  0x34   :  { %v90_v38 = vmul.f32 0.5, %v89_v37 }
  0x36   :  { %v91_v40 = vsub.f32 1.5, %v90_v38 }
  0x38   :  { %v92_v42 = vmul.f32 %v326_v35, %v91_v40 }
  0x3a   :  { %v96_v44 = vsel %vm95_vm3, %v326_v35, %v92_v42 }
  0x3b   :  { %v97_v45 = vmul.f32 %v96_v44, %v85_v41 }
  0x3d   :  { %v99_v47 = vmul.f32 %v98_v43, %v97_v45 }
  0x3f   :  { %v101_v48 = vadd.f32 %v100_v46, %v99_v47 }
  0x41   :  { %v102_v49 = vmax.f32 %v101_v48, 0.0 }
  0x43   :  { %v103_v50 = vadd.f32 %v102_v49, %v58_v5  ;;  %v172_v49 = vperm.slane %v473_v39, 2 }
  0x45   :  { %v104_v51 = vrot.slane %v103_v50, 4  ;;  %v111_v52 = vmul.f32 %v103_v50, %v103_v50 }
  0x47   :  { %v105_v53 = vadd.f32 %v104_v51, %v103_v50  ;;  %v112_v54 = vrot.slane %v111_v52, 4 }
  0x49   :  { %v106_v55 = vrot.slane %v105_v53, 2  ;;  %v113_v56 = vadd.f32 %v112_v54, %v111_v52 }
  0x4b   :  { %v107_v57 = vadd.f32 %v106_v55, %v105_v53  ;;  %v114_v58 = vrot.slane %v113_v56, 2 }
  0x4d   :  { %v108_v59 = vrot.slane %v107_v57, 1  ;;  %v115_v60 = vadd.f32 %v114_v58, %v113_v56 }
  0x4f   :  { %v109_v61 = vadd.f32 %v108_v59, %v107_v57  ;;  %v116_v62 = vrot.slane %v115_v60, 1  ;;  %v195_v57 = vperm.slane %v473_v39, 6 }
  0x51   :  { %v110_v63 = vmul.f32 %v109_v61, %v469_v21  ;;  %v117_v0 = vadd.f32 %v116_v62, %v115_v60 }
  0x53   :  { %v118_v1 = vmul.f32 %v117_v0, %v469_v21  ;;  %v119_v2 = vmul.f32 %v110_v63, %v110_v63  ;;  %v122_v11 = vsub.f32 %v103_v50, %v110_v63 }
  0x55   :  { %v120_v3 = vsub.f32 %v118_v1, %v119_v2 }
  0x57   :  { %v121_v4 = vmax.f32 %v120_v3, 0.0 }
  0x59   :  { %v123_v5 = vadd.f32 1e-05, %v121_v4 }
  0x5b   :  { %327 = vrsqrt.f32 %v123_v5  ;;  %vm130_vm4 = vweird.f32 %v123_v5 }
  0x61   :  { %v328_v6 = vpop.eup %327 }
  0x62   :  { %v125_v7 = vmul.f32 %v328_v6, %v123_v5  ;;  %vm131_vm5 = vweird.f32 %v328_v6 }
  0x63   :  { %vm132_vm6 = vmor %vm130_vm4, %vm131_vm5 }
  0x64   :  { %v126_v8 = vmul.f32 %v328_v6, %v125_v7 }
  0x66   :  { %v127_v9 = vmul.f32 0.5, %v126_v8 }
  0x68   :  { %v128_v10 = vsub.f32 1.5, %v127_v9 }
  0x6a   :  { %v129_v12 = vmul.f32 %v328_v6, %v128_v10 }
  0x6c   :  { %v133_v14 = vsel %vm132_vm6, %v328_v6, %v129_v12 }
  0x6d   :  { %v134_v15 = vmul.f32 %v133_v14, %v122_v11 }
  0x6f   :  { %v136_v17 = vmul.f32 %v135_v13, %v134_v15 }
  0x71   :  { %v138_v18 = vadd.f32 %v137_v16, %v136_v17 }
  0x73   :  { %v139_v19 = vmax.f32 %v138_v18, 0.0 }
  0x75   :  { %v140_v20 = vadd.f32 %v139_v19, %v103_v50 }
  0x77   :  { %v141_v22 = vrot.slane %v140_v20, 4  ;;  %v148_v23 = vmul.f32 %v140_v20, %v140_v20 }
  0x79   :  { %v142_v24 = vadd.f32 %v141_v22, %v140_v20  ;;  %v149_v25 = vrot.slane %v148_v23, 4 }
  0x7b   :  { %v143_v26 = vrot.slane %v142_v24, 2  ;;  %v150_v27 = vadd.f32 %v149_v25, %v148_v23 }
  0x7d   :  { %v144_v28 = vadd.f32 %v143_v26, %v142_v24  ;;  %v151_v29 = vrot.slane %v150_v27, 2 }
  0x7f   :  { %v145_v30 = vrot.slane %v144_v28, 1  ;;  %v152_v31 = vadd.f32 %v151_v29, %v150_v27 }
  0x81   :  { %v146_v32 = vadd.f32 %v145_v30, %v144_v28  ;;  %v153_v33 = vrot.slane %v152_v31, 1 }
  0x83   :  { %v147_v34 = vmul.f32 %v146_v32, %v469_v21  ;;  %v154_v35 = vadd.f32 %v153_v33, %v152_v31 }
  0x85   :  { %v155_v36 = vmul.f32 %v154_v35, %v469_v21  ;;  %v156_v37 = vmul.f32 %v147_v34, %v147_v34  ;;  %v159_v47 = vsub.f32 %v140_v20, %v147_v34  ;;  %v174_v21 = vperm.slane %v473_v39, 5 }
  0x87   :  { %v157_v38 = vsub.f32 %v155_v36, %v156_v37 }
  0x89   :  { %v158_v40 = vmax.f32 %v157_v38, 0.0 }
  0x8b   :  { %v160_v41 = vadd.f32 1e-05, %v158_v40 }
  0x8d   :  { %329 = vrsqrt.f32 %v160_v41  ;;  %vm167_vm7 = vweird.f32 %v160_v41 }
  0x93   :  { %v330_v42 = vpop.eup %329 }
  0x94   :  { %v162_v43 = vmul.f32 %v330_v42, %v160_v41  ;;  %vm168_vm8 = vweird.f32 %v330_v42 }
  0x95   :  { %vm169_vm9 = vmor %vm167_vm7, %vm168_vm8 }
  0x96   :  { %v163_v44 = vmul.f32 %v330_v42, %v162_v43 }
  0x98   :  { %v164_v45 = vmul.f32 0.5, %v163_v44 }
  0x9a   :  { %v165_v46 = vsub.f32 1.5, %v164_v45 }
  0x9c   :  { %v166_v48 = vmul.f32 %v330_v42, %v165_v46 }
  0x9e   :  { %v170_v50 = vsel %vm169_vm9, %v330_v42, %v166_v48 }
  0x9f   :  { %v171_v51 = vmul.f32 %v170_v50, %v159_v47 }
  0xa1   :  { %v173_v52 = vmul.f32 %v172_v49, %v171_v51 }
  0xa3   :  { %v175_v53 = vadd.f32 %v174_v21, %v173_v52 }
  0xa5   :  { %v176_v54 = vmax.f32 %v175_v53, 0.0 }
  0xa7   :  { %v177_v55 = vadd.f32 %v176_v54, %v140_v20 }
  0xa9   :  { %v178_v56 = vpack.c.bf16 %v177_v55, %v177_v55 }
  0xab   :  { %252 = vmatmul.bf16.vlgmr.msra.gmra.mxu0 %v178_v56 }
 0x128   :  { %v253_v58 = vpop.f32.mrf.mxu0 }
 0x129   :  { %v254_v59 = vadd.f32 %v253_v58, %v195_v57 }
 0x12b   :  { %257 = vst [vmem:[#allocation8] sm:$0xff] %v254_v59 }
 0x12c   :  { %268 = dma.vmem_to_hbm [thread:$0]  %s264_s2, 128, %s266_s30, [#allocation4]  }
 0x130   :  { %v255_v60 = vpop.f32.mrf.mxu0 }
 0x131   :  { %431 = dma.done.wait [#allocation4], 128  }
 0x132   :  { %432 = vsyncadd [#allocation4], 4294967168 }
 0x133   :  { %273 = vsyncpa [#allocation3], 1 }
 0x134   :  { %274 = vsyncpa [#allocation6], 1 }
 0x135   :  { %275 = vsyncpa [#allocation4], 1 }

</bundles_post_ra>
